<compile_context>
chip_gen: v7x
topology: tpu7x:2x2x1
jax: 0.10.0
libtpu: 0.0.40
codegen_flags: <defaults>
</compile_context>

<pallas_src>
import jax
import jax.numpy as jnp
import numpy as np
from jax.experimental import pallas as pl
from jax.experimental.pallas import tpu as pltpu


# ----------------------------------------------------------------------------
# Kernel 1: beta = softmax(rho.weight @ alphas.weight.T, dim=0).T  computed in
# (K, V) layout so the softmax is a lane-direction reduction.
# ----------------------------------------------------------------------------
def etm_beta_kernel(alpha_ref, rho_rt_ref, beta_ref):
    # logit_t[k, v] = (alphas.weight @ rho.weight.T)[k, v] == logit[v, k]
    logit = jnp.dot(alpha_ref[...], rho_rt_ref[...],
                    preferred_element_type=jnp.float32)          # (K, V) f32
    m = jnp.max(logit, axis=-1, keepdims=True)
    e = jnp.exp(logit - m)
    denom = jnp.sum(e, axis=-1, keepdims=True)
    beta_ref[...] = e * pl.reciprocal(denom, approx=True)        # rows sum to ~1


# ----------------------------------------------------------------------------
# Kernel 2: per-batch-tile encoder + decode.  Grid = (B_pad // TB,), "parallel".
# ----------------------------------------------------------------------------
def etm_main_kernel(bow_ref, len_ref,
                    w1_ref, b1_ref, w2_ref, b2_ref,
                    wml_ref, bml_ref, beta_ref,
                    theta_ref, stats_ref):
    bow = bow_ref[...]                                           # (TB, V) raw counts, f32
    # normalize: bow / len[:, None]   (EUP reciprocal + VPU multiply)
    nbow = bow * pl.reciprocal(len_ref[...], approx=True)

    # q_theta = Linear -> tanh -> Linear -> tanh   (theta_act = 'tanh')
    h = jnp.tanh(jnp.dot(nbow.astype(w1_ref.dtype), w1_ref[...],
                         preferred_element_type=jnp.float32) + b1_ref[...])
    h = jnp.tanh(jnp.dot(h.astype(w2_ref.dtype), w2_ref[...],
                         preferred_element_type=jnp.float32) + b2_ref[...])
    # TODO(synk): nn.Dropout(enc_drop) is identity in eval mode; no dropout applied here.

    # fused mu / logsigma projection: one (H, 2K) matmul, then slice.
    muls = jnp.dot(h.astype(wml_ref.dtype), wml_ref[...],
                   preferred_element_type=jnp.float32) + bml_ref[...]     # (TB, 2K)
    K = muls.shape[-1] // 2
    mu = muls[:, :K]
    ls = muls[:, K:]

    # per-sample KL: -0.5 * sum(1 + logsigma - mu^2 - exp(logsigma), dim=-1)
    kl = -0.5 * jnp.sum(1.0 + ls - mu * mu - jnp.exp(ls), axis=-1, keepdims=True)

    # theta = softmax(mu, dim=-1)
    m = jnp.max(mu, axis=-1, keepdims=True)
    e = jnp.exp(mu - m)
    theta = e * pl.reciprocal(jnp.sum(e, axis=-1, keepdims=True), approx=True)
    theta_ref[...] = theta

    # decode: res = theta @ beta   (beta already (K, V); lane-dense result)
    res = jnp.dot(theta, beta_ref[...], preferred_element_type=jnp.float32)  # (TB, V)
    preds = jnp.log(res + 1e-6)
    recon = -jnp.sum(preds * bow, axis=-1, keepdims=True)        # (TB, 1)

    # lane-dense stats output: lane 0 = kl, lane 1 = recon, rest 0
    lane = jax.lax.broadcasted_iota(jnp.int32, stats_ref.shape, 1)
    stats_ref[...] = jnp.where(lane == 0, kl, jnp.where(lane == 1, recon, 0.0))


# ----------------------------------------------------------------------------
# Wrapper
# ----------------------------------------------------------------------------
def etm_forward(bow, bow_len, params, *, tb=16):
    """Pallas-backed ETM forward. Returns (theta, kld_theta, recon_loss)."""
    B, V = bow.shape
    H = params["w1_t"].shape[1]
    K = params["wmu_t"].shape[1]

    vm = pl.BlockSpec(memory_space=pltpu.MemorySpace.VMEM)

    # --- beta: computed once, independent of the batch ---
    beta = pl.pallas_call(
        etm_beta_kernel,
        out_shape=jax.ShapeDtypeStruct((K, V), jnp.float32),
        in_specs=[vm, vm],
        out_specs=vm,
    )(params["alpha_w"].astype(jnp.bfloat16),
      params["rho_rt"].astype(jnp.bfloat16))

    # --- fused + bf16-cast encoder weights (biases kept in f32) ---
    w1 = params["w1_t"].astype(jnp.bfloat16)
    w2 = params["w2_t"].astype(jnp.bfloat16)
    wml = jnp.concatenate([params["wmu_t"], params["wls_t"]], axis=1).astype(jnp.bfloat16)
    bml = jnp.concatenate([params["bmu"], params["bls"]], axis=1).astype(jnp.float32)

    bow_f = bow.astype(jnp.float32)
    len_f = bow_len.reshape(B, 1).astype(jnp.float32)

    # Pad the batch up to a multiple of the tile (padded rows: bow=0, len=1).
    nb = pl.cdiv(B, tb)
    B_pad = nb * tb
    pad = B_pad - B
    if pad:
        bow_f = jnp.pad(bow_f, ((0, pad), (0, 0)))
        len_f = jnp.pad(len_f, ((0, pad), (0, 0)), constant_values=1.0)

    const = lambda b: (0, 0)          # weights: same block every grid step (no re-DMA)
    theta, stats = pl.pallas_call(
        etm_main_kernel,
        grid=(nb,),
        in_specs=[
            pl.BlockSpec((tb, V), lambda b: (b, 0)),      # bow tile
            pl.BlockSpec((tb, 1), lambda b: (b, 0)),      # doc lengths
            pl.BlockSpec((V, H), const),                  # w1 (bf16)
            pl.BlockSpec((1, H), const),                  # b1
            pl.BlockSpec((H, H), const),                  # w2 (bf16)
            pl.BlockSpec((1, H), const),                  # b2
            pl.BlockSpec((H, 2 * K), const),              # fused mu/logsigma weight (bf16)
            pl.BlockSpec((1, 2 * K), const),              # fused bias
            pl.BlockSpec((K, V), const),                  # beta
        ],
        out_specs=(
            pl.BlockSpec((tb, K), lambda b: (b, 0)),      # theta
            pl.BlockSpec((tb, 128), lambda b: (b, 0)),    # lane-dense stats
        ),
        out_shape=(
            jax.ShapeDtypeStruct((B_pad, K), jnp.float32),
            jax.ShapeDtypeStruct((B_pad, 128), jnp.float32),
        ),
        compiler_params=pltpu.CompilerParams(
            dimension_semantics=("parallel",),            # shard B tiles across TCs
            vmem_limit_bytes=32 * 1024 * 1024,            # safe on v5e/v6e/v7x
        ),
    )(bow_f, len_f, w1, params["b1"], w2, params["b2"], wml, bml, beta)

    theta = theta[:B]
    kld_theta = jnp.mean(stats[:B, 0])     # .mean() over the real batch
    recon_loss = jnp.mean(stats[:B, 1])    # aggregate=True
    return theta, kld_theta, recon_loss


# ----------------------------------------------------------------------------
# Pure-JAX reference mirroring the PyTorch forward (eval mode), all f32.
# ----------------------------------------------------------------------------
def _reference(bow, bow_len, p):
    nbow = bow / bow_len[:, None]
    h = jnp.tanh(nbow @ p["w1_t"] + p["b1"])
    h = jnp.tanh(h @ p["w2_t"] + p["b2"])
    mu = h @ p["wmu_t"] + p["bmu"]
    ls = h @ p["wls_t"] + p["bls"]
    kl = jnp.mean(-0.5 * jnp.sum(1 + ls - mu**2 - jnp.exp(ls), axis=-1))
    theta = jax.nn.softmax(mu, axis=-1)
    logit = (p["alpha_w"] @ p["rho_rt"]).T                # (V, K) == rho.weight @ alphas.weight.T
    beta = jax.nn.softmax(logit, axis=0).T                # (K, V)
    preds = jnp.log(theta @ beta + 1e-6)
    recon = jnp.mean(-jnp.sum(preds * bow, axis=1))
    return theta, kl, recon


if __name__ == "__main__":
    # Small, TPU-friendly shapes consistent with the module's __init__.
    B = 64           # batch size (4 batch tiles of 16 -> exercises the grid / megacore)
    V = 512          # vocab_size
    H = 128          # t_hidden_size
    R = 128          # rho_size
    K = 8            # num_topics

    key = jax.random.PRNGKey(0)
    keys = jax.random.split(key, 12)

    def unif(k, shape, fan_in):
        bound = 1.0 / np.sqrt(fan_in)
        return jax.random.uniform(k, shape, jnp.float32, -bound, bound)

    # Parameters stored in the layouts the kernels want:
    #   linear weights pre-transposed to (in, out); rho pre-transposed to (R, V);
    #   alphas.weight kept as (K, R).
    params = {
        "w1_t":    unif(keys[0], (V, H), V),      # q_theta[0].weight.T
        "b1":      unif(keys[1], (1, H), V),      # q_theta[0].bias
        "w2_t":    unif(keys[2], (H, H), H),      # q_theta[2].weight.T
        "b2":      unif(keys[3], (1, H), H),      # q_theta[2].bias
        "wmu_t":   unif(keys[4], (H, K), H),      # mu_q_theta.weight.T
        "bmu":     unif(keys[5], (1, K), H),      # mu_q_theta.bias
        "wls_t":   unif(keys[6], (H, K), H),      # logsigma_q_theta.weight.T
        "bls":     unif(keys[7], (1, K), H),      # logsigma_q_theta.bias
        "rho_rt":  unif(keys[8], (R, V), R),      # rho.weight.T   (rho_size, vocab)
        "alpha_w": unif(keys[9], (K, R), R),      # alphas.weight  (num_topics, rho_size)
    }

    # Example bag-of-words input (raw counts) and document lengths.
    bow = jax.random.randint(keys[10], (B, V), 0, 5).astype(jnp.float32)
    bow_len = jnp.maximum(jnp.sum(bow, axis=1), 1.0)   # (B,)

    theta, kld_theta, recon_loss = etm_forward(bow, bow_len, params)
    jax.block_until_ready((theta, kld_theta, recon_loss))

    # Sanity check against the f32 reference (tolerances relaxed for bf16 weights
    # and approx reciprocals).
    theta_r, kl_r, rec_r = _reference(bow, bow_len, params)
    np.testing.assert_allclose(np.asarray(theta), np.asarray(theta_r), rtol=1e-2, atol=5e-3)
    np.testing.assert_allclose(float(kld_theta), float(kl_r), rtol=5e-2, atol=5e-3)
    np.testing.assert_allclose(float(recon_loss), float(rec_r), rtol=2e-2)

    print("KERNEL_OK")
</pallas_src>

<mosaic_0001>
module attributes {stable_mosaic.version = 11 : i64} {
  func.func @etm_beta_kernel(%arg0: memref<8x128xbf16, #tpu.memory_space<vmem>>, %arg1: memref<128x512xbf16, #tpu.memory_space<vmem>>, %arg2: memref<8x512xf32, #tpu.memory_space<vmem>>) attributes {dimension_semantics = [], scalar_prefetch = 0 : i64, scratch_operands = 0 : i64, tpu.core_type = #tpu.core_type<tc>} {
    %c0 = arith.constant 0 : index
    %c0_0 = arith.constant 0 : index
    %0 = vector.load %arg0[%c0, %c0_0] : memref<8x128xbf16, #tpu.memory_space<vmem>>, vector<8x128xbf16>
    %c0_1 = arith.constant 0 : index
    %c0_2 = arith.constant 0 : index
    %1 = vector.load %arg1[%c0_1, %c0_2] : memref<128x512xbf16, #tpu.memory_space<vmem>>, vector<128x512xbf16>
    %cst = arith.constant dense<0.000000e+00> : vector<8x512xf32>
    %2 = tpu.matmul %0, %1, %cst {dimension_numbers = #tpu.dot_dimension_numbers<[1], [0], [0], [1], [0, 0, 1, 1], [], []>} : vector<8x128xbf16>, vector<128x512xbf16>, vector<8x512xf32> -> vector<8x512xf32>
    %cst_3 = arith.constant dense<0xFF800000> : vector<8xf32>
    %3 = vector.multi_reduction <maximumf>, %2, %cst_3 [1] : vector<8x512xf32> to vector<8xf32>
    %4 = vector.shape_cast %3 : vector<8xf32> to vector<8x1xf32>
    %5 = vector.broadcast %4 : vector<8x1xf32> to vector<8x512xf32>
    %6 = arith.subf %2, %5 : vector<8x512xf32>
    %7 = math.exp %6 : vector<8x512xf32>
    %cst_4 = arith.constant dense<0.000000e+00> : vector<8xf32>
    %8 = vector.multi_reduction <add>, %7, %cst_4 [1] : vector<8x512xf32> to vector<8xf32>
    %9 = vector.shape_cast %8 : vector<8xf32> to vector<8x1xf32>
    %10 = tpu.reciprocal %9 {approx = true} : vector<8x1xf32> -> vector<8x1xf32>
    %11 = vector.broadcast %10 : vector<8x1xf32> to vector<8x512xf32>
    %12 = arith.mulf %7, %11 : vector<8x512xf32>
    %c0_5 = arith.constant 0 : index
    %c0_6 = arith.constant 0 : index
    %13 = vector.load %arg2[%c0_5, %c0_6] : memref<8x512xf32, #tpu.memory_space<vmem>>, vector<8x512xf32>
    tpu.vector_store %arg2[%c0_5, %c0_6], %12 {strides = array<i32>} : memref<8x512xf32, #tpu.memory_space<vmem>>, vector<8x512xf32>,
    return
  }
}

</mosaic_0001>

<bundles_post_ra>
// kernel: tpu_custom_call.1
= control target key start
LH: loop header
LB: loop body
LE: loop exit
PB: predicated region body
PF: predicated region fallthrough
CT: control target
= control target key end

     0   :  { %7 = vsyncpa [#allocation3], 0  ;;  %s593_s0 = inlined_call_operand.hbm [shape: bf16[8,128], index: 0, kind: input, shape index: {}]   ;;  %s594_s1 = inlined_call_operand.hbm [shape: bf16[128,512], index: 1, kind: input, shape index: {}]   ;;  %s595_s2 = inlined_call_operand.hbm [shape: f32[8,512], index: 2, kind: output, shape index: {}]  }
   0x1   :  { %8 = vsyncpa [#allocation6], 0 }
   0x2   :  { %9 = vsyncpa [#allocation4], 0  ;;  %s529_s9 = smov [#allocation2]   ;;  %s530_s11 = smov [#allocation5]  }
   0x3   :  { %s16_s10 = sshll.u32 %s529_s9, 4  ;;  %s25_s12 = sshll.u32 %s530_s11, 4  ;;  %s17_s10 = int_to_ptr.vmem [resolvable:$true] %s16_s10  ;;  %s550_s12 = int_to_ptr.vmem [resolvable:$true] %s25_s12 }
   0x4   :  { %s457_s15 = scalar_lea.hbm %s593_s0, 64 }
   0x5   :  { %p458_p0 = scmp.ne.s32.totalorder %s593_s0, %s457_s15  ;;  %p461_p1 = scmp.lt.u32.totalorder %s457_s15, %s593_s0 }
   0x7   :  { %p463_p2 = pnand %p461_p1, %p458_p0 }
   0x9   :  { %466 = shalt.err (!%p463_p2)
}
   0xa   :  { %s467_s20 = scalar_lea.vmem %s17_s10, 64  ;;  %p472_p4 = scmp.lt.s32.totalorder %s17_s10, %s17_s10 }
   0xb   :  { %p468_p3 = scmp.ne.s32.totalorder %s17_s10, %s467_s20  ;;  %p473_p5 = scmp.lt.s32.totalorder %s467_s20, %s467_s20 }
   0xd   :  { %p474_p6 = por %p473_p5, %p472_p4 }
   0xf   :  { %p475_p7 = pnand %p474_p6, %p468_p3 }
  0x11   :  { %478 = shalt.err (!%p475_p7)
}
  0x12   :  { %19 = dma.hbm_to_vmem [thread:$0]  %s593_s0, 64, %s17_s10, [#allocation3]  }
  0x13   :  { %s479_s25 = scalar_lea.hbm %s594_s1, 4096 }
  0x14   :  { %p480_p8 = scmp.ne.s32.totalorder %s594_s1, %s479_s25  ;;  %p483_p9 = scmp.lt.u32.totalorder %s479_s25, %s594_s1 }
  0x16   :  { %p485_p10 = pnand %p483_p9, %p480_p8 }
  0x18   :  { %488 = shalt.err (!%p485_p10)
}
  0x19   :  { %s489_s30 = scalar_lea.vmem %s550_s12, 4096  ;;  %p494_p12 = scmp.lt.s32.totalorder %s550_s12, %s550_s12 }
  0x1a   :  { %p490_p11 = scmp.ne.s32.totalorder %s550_s12, %s489_s30  ;;  %p495_p13 = scmp.lt.s32.totalorder %s489_s30, %s489_s30 }
  0x1c   :  { %p496_p0 = por %p495_p13, %p494_p12 }
  0x1e   :  { %p497_p1 = pnand %p496_p0, %p490_p11 }
  0x20   :  { %500 = shalt.err (!%p497_p1)
}
  0x21   :  { %s531_s0 = smov 256   ;;  %s532_s3 = smov 16  }
  0x22   :  { %31 = dma.hbm_to_vmem [thread:$0]  %s594_s1, 4096, %s550_s12, [#allocation6], %s531_s0, %s531_s0, %s532_s3  }
  0x23   :  { %523 = dma.done.wait [#allocation3], 64  }
  0x24   :  { %524 = vsyncadd [#allocation3], 4294967232 }
  0x25   :  { %525 = dma.done.wait [#allocation6], 4096  }
  0x26   :  { %526 = vsyncadd [#allocation6], 4294963200  ;;  %v533_v0 = vmov 0   ;;  %v399_v1 = vld [vmem:[#allocation5 + $0x4] ss:$16 sps:$4 sm:$0xff]   ;;  %s534_s1 = smov [#allocation7]  }
  0x27   :  { %264 = vmatprep.mubr.bf16.mxu0 %v533_v0  ;;  %305 = vmatprep.mubr.bf16.mxu1 %v533_v0  ;;  %v401_v2 = vld [vmem:[#allocation5 + $0xc] ss:$16 sps:$4 sm:$0xff]   ;;  %v403_v3 = vld [vmem:[#allocation5] ss:$16 sps:$4 sm:$0xff]   ;;  %v404_v4 = vld [vmem:[#allocation5 + $0x8] ss:$16 sps:$4 sm:$0xff]  }
  0x28   :  { %232 = vmatprep.subr.bf16.mxu0 %v399_v1  ;;  %273 = vmatprep.subr.bf16.mxu1 %v401_v2  ;;  %v405_v5 = vld [vmem:[#allocation5 + $0x24] ss:$16 sps:$4 sm:$0xff]   ;;  %v407_v6 = vld [vmem:[#allocation5 + $0x2c] ss:$16 sps:$4 sm:$0xff]   ;;  %v409_v7 = vld [vmem:[#allocation5 + $0x20] ss:$16 sps:$4 sm:$0xff]  }
  0x29   :  { %233 = vmatpush1.bf16.msra.mxu0 %v403_v3  ;;  %274 = vmatpush1.bf16.msra.mxu1 %v404_v4  ;;  %v410_v8 = vld [vmem:[#allocation5 + $0x28] ss:$16 sps:$4 sm:$0xff]   ;;  %v411_v9 = vld [vmem:[#allocation5 + $0x44] ss:$16 sps:$4 sm:$0xff]   ;;  %v413_v10 = vld [vmem:[#allocation5 + $0x4c] ss:$16 sps:$4 sm:$0xff]  }
  0x2a   :  { %234 = vmatprep.subr.bf16.mxu0 %v405_v5  ;;  %275 = vmatprep.subr.bf16.mxu1 %v407_v6  ;;  %v415_v11 = vld [vmem:[#allocation5 + $0x40] ss:$16 sps:$4 sm:$0xff]   ;;  %v416_v12 = vld [vmem:[#allocation5 + $0x48] ss:$16 sps:$4 sm:$0xff]   ;;  %v417_v13 = vld [vmem:[#allocation5 + $0x64] ss:$16 sps:$4 sm:$0xff]  }
  0x2b   :  { %v419_v14 = vld [vmem:[#allocation5 + $0x6c] ss:$16 sps:$4 sm:$0xff]   ;;  %v421_v15 = vld [vmem:[#allocation5 + $0x60] ss:$16 sps:$4 sm:$0xff]   ;;  %v422_v16 = vld [vmem:[#allocation5 + $0x68] ss:$16 sps:$4 sm:$0xff]  }
  0x2c   :  { %v423_v17 = vld [vmem:[#allocation5 + $0x84] ss:$16 sps:$4 sm:$0xff]   ;;  %v425_v18 = vld [vmem:[#allocation5 + $0x8c] ss:$16 sps:$4 sm:$0xff]   ;;  %v427_v19 = vld [vmem:[#allocation5 + $0x80] ss:$16 sps:$4 sm:$0xff]  }
  0x2d   :  { %235 = vmatpush1.bf16.msra.mxu0 %v409_v7  ;;  %276 = vmatpush1.bf16.msra.mxu1 %v410_v8  ;;  %v428_v20 = vld [vmem:[#allocation5 + $0x88] ss:$16 sps:$4 sm:$0xff]   ;;  %v429_v21 = vld [vmem:[#allocation5 + $0xa4] ss:$16 sps:$4 sm:$0xff]   ;;  %v431_v22 = vld [vmem:[#allocation5 + $0xac] ss:$16 sps:$4 sm:$0xff]  }
  0x2e   :  { %236 = vmatprep.subr.bf16.mxu0 %v411_v9  ;;  %277 = vmatprep.subr.bf16.mxu1 %v413_v10  ;;  %v433_v23 = vld [vmem:[#allocation5 + $0xa0] ss:$16 sps:$4 sm:$0xff]   ;;  %v434_v24 = vld [vmem:[#allocation5 + $0xa8] ss:$16 sps:$4 sm:$0xff]   ;;  %v435_v25 = vld [vmem:[#allocation5 + $0xc4] ss:$16 sps:$4 sm:$0xff]  }
  0x2f   :  { %v437_v26 = vld [vmem:[#allocation5 + $0xcc] ss:$16 sps:$4 sm:$0xff]   ;;  %v439_v27 = vld [vmem:[#allocation5 + $0xc0] ss:$16 sps:$4 sm:$0xff]   ;;  %v440_v28 = vld [vmem:[#allocation5 + $0xc8] ss:$16 sps:$4 sm:$0xff]  }
  0x30   :  { %v441_v29 = vld [vmem:[#allocation5 + $0xe4] ss:$16 sps:$4 sm:$0xff]   ;;  %v443_v30 = vld [vmem:[#allocation5 + $0xec] ss:$16 sps:$4 sm:$0xff]   ;;  %v445_v31 = vld [vmem:[#allocation5 + $0xe0] ss:$16 sps:$4 sm:$0xff]  }
  0x31   :  { %237 = vmatpush1.bf16.msra.mxu0 %v415_v11  ;;  %278 = vmatpush1.bf16.msra.mxu1 %v416_v12  ;;  %v446_v32 = vld [vmem:[#allocation5 + $0xe8] ss:$16 sps:$4 sm:$0xff]   ;;  %v39_v33 = vld [vmem:[#allocation2] sm:$0xf]  ;;  %s351_s6 = sshll.u32 %s534_s1, 4  ;;  %s352_s6 = int_to_ptr.vmem [resolvable:$true] %s351_s6 }
  0x32   :  { %238 = vmatprep.subr.bf16.mxu0 %v417_v13  ;;  %279 = vmatprep.subr.bf16.mxu1 %v419_v14  ;;  %s501_s7 = scalar_lea.vmem %s352_s6, 512  ;;  %p506_p3 = scmp.lt.s32.totalorder %s352_s6, %s352_s6 }
  0x33   :  { %p502_p2 = scmp.ne.s32.totalorder %s352_s6, %s501_s7  ;;  %p507_p4 = scmp.lt.s32.totalorder %s501_s7, %s501_s7 }
  0x35   :  { %239 = vmatpush1.bf16.msra.mxu0 %v421_v15  ;;  %280 = vmatpush1.bf16.msra.mxu1 %v422_v16  ;;  %p508_p5 = por %p507_p4, %p506_p3 }
  0x36   :  { %240 = vmatprep.subr.bf16.mxu0 %v423_v17  ;;  %281 = vmatprep.subr.bf16.mxu1 %v425_v18 }
  0x37   :  { %p509_p6 = pnand %p508_p5, %p502_p2 }
  0x39   :  { %241 = vmatpush1.bf16.msra.mxu0 %v427_v19  ;;  %282 = vmatpush1.bf16.msra.mxu1 %v428_v20 }
  0x3a   :  { %242 = vmatprep.subr.bf16.mxu0 %v429_v21  ;;  %283 = vmatprep.subr.bf16.mxu1 %v431_v22 }
  0x3d   :  { %243 = vmatpush1.bf16.msra.mxu0 %v433_v23  ;;  %284 = vmatpush1.bf16.msra.mxu1 %v434_v24 }
  0x3e   :  { %244 = vmatprep.subr.bf16.mxu0 %v435_v25  ;;  %285 = vmatprep.subr.bf16.mxu1 %v437_v26 }
  0x41   :  { %245 = vmatpush1.bf16.msra.mxu0 %v439_v27  ;;  %286 = vmatpush1.bf16.msra.mxu1 %v440_v28 }
  0x42   :  { %246 = vmatprep.subr.bf16.mxu0 %v441_v29  ;;  %287 = vmatprep.subr.bf16.mxu1 %v443_v30 }
  0x45   :  { %247 = vmatpush1.bf16.msra.mxu0 %v445_v31  ;;  %288 = vmatpush1.bf16.msra.mxu1 %v446_v32 }
  0x48   :  { %265 = vmatmul.mubr.bf16.vlgmr.msra.gmra.mrb[0].mxu0 %v39_v33  ;;  %306 = vmatmul.mubr.bf16.vlgmr.msra.gmra.mrb[0].mxu1 %v39_v33 }
 0x11b   :  { %v266_v34 = vpop.f32.mrb[0].mxu0  ;;  %v307_v35 = vpop.f32.mrb[0].mxu1 }
 0x11c   :  { %v268_v36 = vpop.f32.mrb[1].mxu0  ;;  %v309_v37 = vpop.f32.mrb[1].mxu1 }
 0x11d   :  { %v314_v38 = vmax.f32 %v266_v34, %v268_v36  ;;  %v315_v39 = vmax.f32 %v307_v35, %v309_v37  ;;  %v270_v40 = vpop.f32.mrb[2].mxu0  ;;  %v311_v41 = vpop.f32.mrb[2].mxu1 }
 0x11e   :  { %v271_v42 = vpop.f32.mrb[3].mxu0  ;;  %v312_v43 = vpop.f32.mrb[3].mxu1 }
 0x11f   :  { %v316_v44 = vmax.f32 %v314_v38, %v315_v39 }
 0x121   :  { %317 = vmax.xlane.f32.xlu0 %v316_v44 }
 0x1ae   :  { %v318_v45 = vpop.xlane.xlu0 %317 }
 0x1af   :  { %v319_v46 = vsub.f32 %v266_v34, %v318_v45  ;;  %v320_v47 = vsub.f32 %v268_v36, %v318_v45  ;;  %v321_v48 = vsub.f32 %v307_v35, %v318_v45  ;;  %v322_v49 = vsub.f32 %v309_v37, %v318_v45 }
 0x1b1   :  { %v323_v50 = vmul.f32 1.442695, %v319_v46  ;;  %v325_v51 = vmul.f32 1.442695, %v320_v47  ;;  %v327_v52 = vmul.f32 1.442695, %v321_v48 }
 0x1b2   :  { %v329_v53 = vmul.f32 1.442695, %v322_v49 }
 0x1b3   :  { %447 = vpow2.f32 %v323_v50 }
 0x1b4   :  { %449 = vpow2.f32 %v325_v51 }
 0x1b5   :  { %451 = vpow2.f32 %v327_v52 }
 0x1b6   :  { %453 = vpow2.f32 %v329_v53 }
 0x1bd   :  { %v448_v54 = vpop.eup %447 }
 0x1be   :  { %v450_v55 = vpop.eup %449 }
 0x1bf   :  { %v331_v56 = vadd.f32 %v450_v55, %v448_v54  ;;  %v452_v57 = vpop.eup %451 }
 0x1c0   :  { %v454_v59 = vpop.eup %453 }
 0x1c1   :  { %v332_v58 = vadd.f32 %v452_v57, %v331_v56 }
 0x1c3   :  { %v333_v60 = vadd.f32 %v454_v59, %v332_v58 }
 0x1c5   :  { %334 = vadd.xlane.f32.xlu0 %v333_v60 }
 0x252   :  { %v335_v61 = vpop.xlane.xlu0 %334 }
 0x253   :  { %455 = vrcp.f32 %v335_v61 }
 0x25d   :  { %v456_v62 = vpop.eup %455 }
 0x25e   :  { %v337_v63 = vmul.f32 %v456_v62, %v448_v54  ;;  %v338_v0 = vmul.f32 %v456_v62, %v450_v55  ;;  %v339_v1 = vmul.f32 %v456_v62, %v452_v57  ;;  %v340_v2 = vmul.f32 %v456_v62, %v454_v59 }
 0x260   :  { %341 = vst [vmem:[#allocation7] sm:$0xff] %v337_v63  ;;  %342 = vst [vmem:[#allocation7 + $0x8] sm:$0xff] %v338_v0 }
 0x261   :  { %343 = vst [vmem:[#allocation7 + $0x10] sm:$0xff] %v339_v1  ;;  %344 = vst [vmem:[#allocation7 + $0x18] sm:$0xff] %v340_v2 }
 0x262   :  { %512 = shalt.err (!%p509_p6)
}
 0x263   :  { %s513_s10 = scalar_lea.hbm %s595_s2, 512 }
 0x264   :  { %p514_p7 = scmp.ne.s32.totalorder %s595_s2, %s513_s10  ;;  %p517_p8 = scmp.lt.u32.totalorder %s513_s10, %s595_s2 }
 0x266   :  { %p519_p9 = pnand %p517_p8, %p514_p7 }
 0x268   :  { %522 = shalt.err (!%p519_p9)
}
 0x269   :  { %354 = dma.vmem_to_hbm [thread:$0]  %s352_s6, 512, %s595_s2, [#allocation4]  }
 0x26a   :  { %527 = dma.done.wait [#allocation4], 512  }
 0x26b   :  { %528 = vsyncadd [#allocation4], 4294966784 }
 0x26c   :  { %358 = vsyncpa [#allocation3], 1 }
 0x26d   :  { %359 = vsyncpa [#allocation6], 1 }
 0x26e   :  { %360 = vsyncpa [#allocation4], 1 }

</bundles_post_ra>
